<compile_context>
chip_gen: v5e
topology: v5e:2x2
jax: 0.10.0
libtpu: 0.0.40
codegen_flags: <defaults>
</compile_context>

<pallas_src>
import jax
import jax.numpy as jnp
from jax.experimental import pallas as pl
from jax.experimental.pallas import tpu as pltpu


# ---------------------------------------------------------------------------
# PAM_Module: position attention (flash-style online softmax over N = H*W)
# ---------------------------------------------------------------------------

def _pam_flash_kernel(xq_ref, xkv_ref, wq_ref, bq_ref, wk_ref, wv_ref, bv_ref,
                      gamma_ref, o_ref, q_sc, m_sc, l_sc, acc_sc):
    """One (batch, q-tile, kv-tile) grid step of PAM attention.

    Per-block shapes:
      xq_ref  : (1, C, TQ)   input tile holding the query columns (+ residual)
      xkv_ref : (1, C, TKV)  input tile holding the key/value columns
      wq_ref  : (C8, C), bq_ref: (C8, 1)
      wk_ref  : (C8, C)                     (bk dropped -- softmax invariant)
      wv_ref  : (C, C),  bv_ref: (C, 1)
      gamma   : (1,) f32 in SMEM
      o_ref   : (1, C, TQ)
      scratch : q_sc (C8, TQ) bf16, m_sc/l_sc (1, TQ) f32, acc_sc (C, TQ) f32
    """
    kv = pl.program_id(2)

    @pl.when(kv == 0)
    def _init():
        xq = xq_ref[0].astype(jnp.float32)                                # (C, TQ)
        # query projection (1x1 conv), computed once per query tile
        q = jnp.dot(wq_ref[...], xq,
                    preferred_element_type=jnp.float32) + bq_ref[...]     # (C8, TQ)
        q_sc[...] = q.astype(jnp.bfloat16)
        m_sc[...] = jnp.full_like(m_sc, -jnp.inf)
        l_sc[...] = jnp.zeros_like(l_sc)
        acc_sc[...] = jnp.zeros_like(acc_sc)

    xkv = xkv_ref[0].astype(jnp.float32)                                  # (C, TKV)
    # key / value projections for this KV tile
    k = jnp.dot(wk_ref[...], xkv, preferred_element_type=jnp.float32)     # (C8, TKV)
    v = jnp.dot(wv_ref[...], xkv,
                preferred_element_type=jnp.float32) + bv_ref[...]         # (C, TKV)

    # e[j, i] = energy[i, j] = <q_i, k_j>; the softmax axis (j) is axis 0 of e,
    # so the running stats (m, l) and the accumulator are lane-dense over TQ.
    e = jax.lax.dot_general(
        k.astype(jnp.bfloat16), q_sc[...],
        dimension_numbers=(((0,), (0,)), ((), ())),
        preferred_element_type=jnp.float32)                               # (TKV, TQ)

    m_prev = m_sc[...]
    m_new = jnp.maximum(m_prev, jnp.max(e, axis=0, keepdims=True))        # (1, TQ)
    alpha = jnp.exp(m_prev - m_new)                                       # (1, TQ)
    p = jnp.exp(e - m_new)                                                # (TKV, TQ)
    l_sc[...] = alpha * l_sc[...] + jnp.sum(p, axis=0, keepdims=True)
    acc_sc[...] = alpha * acc_sc[...] + jnp.dot(
        v.astype(jnp.bfloat16), p.astype(jnp.bfloat16),
        preferred_element_type=jnp.float32)                               # (C, TQ)
    m_sc[...] = m_new

    @pl.when(kv == pl.num_programs(2) - 1)
    def _finalize():
        inv_l = pl.reciprocal(l_sc[...], approx=True)                     # (1, TQ)
        out = gamma_ref[0] * (acc_sc[...] * inv_l) + xq_ref[0].astype(jnp.float32)
        o_ref[0] = out.astype(o_ref.dtype)


def _pick_tile(n):
    for t in (512, 256, 128):
        if n % t == 0:
            return t
    # TODO(synk): pad/mask ragged N instead of falling back to a single full tile.
    return n


def pam_forward(x_nchw, wq, bq, wk, bk, wv, bv, gamma, *, tq=None, tkv=None):
    """PAM_Module forward.  x: (B, C, H, W); conv weights in PyTorch (Cout, Cin)."""
    del bk  # softmax over key positions is invariant to the key bias
    B, C, H, W = x_nchw.shape
    N = H * W
    C8 = wq.shape[0]
    TQ = tq or _pick_tile(N)
    TKV = tkv or _pick_tile(N)
    assert N % TQ == 0 and N % TKV == 0, "N must be divisible by the tile sizes"

    x_bcn = x_nchw.reshape(B, C, N)            # channels-first: no transpose needed
    wq_f = wq.astype(jnp.float32)
    wk_f = wk.astype(jnp.float32)
    wv_f = wv.astype(jnp.float32)
    bq2 = bq.reshape(C8, 1).astype(jnp.float32)
    bv2 = bv.reshape(C, 1).astype(jnp.float32)
    gamma1 = jnp.asarray(gamma, jnp.float32).reshape(1)

    # Rough VMEM budget (double-buffered blocks + scratch) with 2x headroom,
    # clamped so it also fits v7x's smaller per-core VMEM.
    blk_bytes = 4 * (2 * C * TQ            # xq (double-buffered)
                     + 2 * C * TKV         # xkv
                     + 2 * C * TQ          # out
                     + 2 * (2 * C8 * C + C * C + C8 + C)   # weights / biases
                     + C * TQ              # acc scratch
                     + 16 * TQ)            # m, l (sublane-padded)
    blk_bytes += 2 * C8 * TQ               # q scratch (bf16)
    vmem_limit = int(min(max(2 * blk_bytes, 16 * 1024 * 1024), 48 * 1024 * 1024))

    out_bcn = pl.pallas_call(
        _pam_flash_kernel,
        out_shape=jax.ShapeDtypeStruct((B, C, N), x_nchw.dtype),
        grid_spec=pltpu.PrefetchScalarGridSpec(
            num_scalar_prefetch=0,
            grid=(B, N // TQ, N // TKV),
            in_specs=[
                pl.BlockSpec((1, C, TQ), lambda b, qi, kv: (b, 0, qi)),    # x (q cols)
                pl.BlockSpec((1, C, TKV), lambda b, qi, kv: (b, 0, kv)),   # x (kv cols)
                pl.BlockSpec((C8, C), lambda b, qi, kv: (0, 0)),           # Wq
                pl.BlockSpec((C8, 1), lambda b, qi, kv: (0, 0)),           # bq
                pl.BlockSpec((C8, C), lambda b, qi, kv: (0, 0)),           # Wk
                pl.BlockSpec((C, C), lambda b, qi, kv: (0, 0)),            # Wv
                pl.BlockSpec((C, 1), lambda b, qi, kv: (0, 0)),            # bv
                pl.BlockSpec(memory_space=pltpu.MemorySpace.SMEM),         # gamma
            ],
            out_specs=pl.BlockSpec((1, C, TQ), lambda b, qi, kv: (b, 0, qi)),
            scratch_shapes=[
                pltpu.VMEM((C8, TQ), jnp.bfloat16),   # q tile (persists over kv)
                pltpu.VMEM((1, TQ), jnp.float32),     # running max m
                pltpu.VMEM((1, TQ), jnp.float32),     # running sum l
                pltpu.VMEM((C, TQ), jnp.float32),     # output accumulator
            ],
        ),
        compiler_params=pltpu.CompilerParams(
            dimension_semantics=("parallel", "parallel", "arbitrary"),
            vmem_limit_bytes=vmem_limit),
    )(x_bcn, x_bcn, wq_f, bq2, wk_f, wv_f, bv2, gamma1)

    return out_bcn.reshape(B, C, H, W)


# ---------------------------------------------------------------------------
# CAM_Module: channel attention (C x C energy accumulated over spatial tiles)
# ---------------------------------------------------------------------------

def _cam_attn_kernel(x_ref, attn_ref, e_sc):
    """Accumulate energy = x @ x^T over spatial tiles, then softmax(max - e)."""
    n = pl.program_id(1)

    @pl.when(n == 0)
    def _init():
        e_sc[...] = jnp.zeros_like(e_sc)

    xt = x_ref[0].astype(jnp.float32)                                     # (C, T)
    e_sc[...] += jax.lax.dot_general(
        xt, xt, dimension_numbers=(((1,), (1,)), ((), ())),
        preferred_element_type=jnp.float32)                               # (C, C)

    @pl.when(n == pl.num_programs(1) - 1)
    def _finalize():
        e = e_sc[...]
        e_new = jnp.max(e, axis=-1, keepdims=True) - e
        m = jnp.max(e_new, axis=-1, keepdims=True)
        p = jnp.exp(e_new - m)
        attn_ref[0] = (p / jnp.sum(p, axis=-1, keepdims=True)).astype(attn_ref.dtype)


def _cam_apply_kernel(attn_ref, x_ref, gamma_ref, o_ref):
    """out_tile = gamma * (attn @ x_tile) + x_tile."""
    xt = x_ref[0].astype(jnp.float32)                                     # (C, T)
    out = jnp.dot(attn_ref[0], xt, preferred_element_type=jnp.float32)    # (C, T)
    o_ref[0] = (gamma_ref[0] * out + xt).astype(o_ref.dtype)


def cam_forward(x_nchw, gamma, *, tn=None):
    """CAM_Module forward.  x: (B, C, H, W)."""
    B, C, H, W = x_nchw.shape
    N = H * W
    T = tn or _pick_tile(N)
    assert N % T == 0, "N must be divisible by the tile size"

    x_bcn = x_nchw.reshape(B, C, N)
    gamma1 = jnp.asarray(gamma, jnp.float32).reshape(1)

    # Pass 1: C x C attention per batch (reduction over spatial tiles).
    attn = pl.pallas_call(
        _cam_attn_kernel,
        out_shape=jax.ShapeDtypeStruct((B, C, C), jnp.float32),
        grid_spec=pltpu.PrefetchScalarGridSpec(
            num_scalar_prefetch=0,
            grid=(B, N // T),
            in_specs=[pl.BlockSpec((1, C, T), lambda b, n: (b, 0, n))],
            out_specs=pl.BlockSpec((1, C, C), lambda b, n: (b, 0, 0)),
            scratch_shapes=[pltpu.VMEM((C, C), jnp.float32)],
        ),
        compiler_params=pltpu.CompilerParams(
            dimension_semantics=("parallel", "arbitrary")),
    )(x_bcn)

    # Pass 2: apply attention to each spatial tile + gamma-scaled residual.
    out_bcn = pl.pallas_call(
        _cam_apply_kernel,
        out_shape=jax.ShapeDtypeStruct((B, C, N), x_nchw.dtype),
        grid_spec=pltpu.PrefetchScalarGridSpec(
            num_scalar_prefetch=0,
            grid=(B, N // T),
            in_specs=[
                pl.BlockSpec((1, C, C), lambda b, n: (b, 0, 0)),           # attention
                pl.BlockSpec((1, C, T), lambda b, n: (b, 0, n)),           # x tile
                pl.BlockSpec(memory_space=pltpu.MemorySpace.SMEM),         # gamma
            ],
            out_specs=pl.BlockSpec((1, C, T), lambda b, n: (b, 0, n)),
        ),
        compiler_params=pltpu.CompilerParams(
            dimension_semantics=("parallel", "parallel")),
    )(attn, x_bcn, gamma1)

    return out_bcn.reshape(B, C, H, W)


# ---------------------------------------------------------------------------
# Pure-JAX references (mirror the PyTorch modules)
# ---------------------------------------------------------------------------

def pam_reference(x_nchw, wq, bq, wk, bk, wv, bv, gamma):
    B, C, H, W = x_nchw.shape
    N = H * W
    xf = x_nchw.reshape(B, C, N)                                    # (B, C, N)
    q = jnp.einsum('oc,bcn->bon', wq, xf) + bq[None, :, None]       # (B, C8, N)
    k = jnp.einsum('oc,bcn->bon', wk, xf) + bk[None, :, None]
    v = jnp.einsum('oc,bcn->bon', wv, xf) + bv[None, :, None]       # (B, C, N)
    energy = jnp.einsum('bci,bcj->bij', q, k)                       # (B, N, N)
    attn = jax.nn.softmax(energy, axis=-1)
    out = jnp.einsum('bcj,bij->bci', v, attn)                       # (B, C, N)
    return gamma * out.reshape(B, C, H, W) + x_nchw


def cam_reference(x_nchw, gamma):
    B, C, H, W = x_nchw.shape
    xf = x_nchw.reshape(B, C, -1)                                   # (B, C, N)
    energy = jnp.einsum('bcn,bdn->bcd', xf, xf)                     # (B, C, C)
    energy_new = jnp.max(energy, axis=-1, keepdims=True) - energy
    attn = jax.nn.softmax(energy_new, axis=-1)
    out = jnp.einsum('bcd,bdn->bcn', attn, xf)                      # (B, C, N)
    return gamma * out.reshape(B, C, H, W) + x_nchw


if __name__ == "__main__":
    key = jax.random.PRNGKey(0)
    B, C, H, W = 2, 32, 16, 16          # in_dim = 32 -> query/key channels = 32 // 8 = 4
    C8 = C // 8

    ks = jax.random.split(key, 8)
    x = jax.random.normal(ks[0], (B, C, H, W), dtype=jnp.float32)
    wq = jax.random.normal(ks[1], (C8, C), dtype=jnp.float32) * 0.1
    bq = jax.random.normal(ks[2], (C8,), dtype=jnp.float32) * 0.1
    wk = jax.random.normal(ks[3], (C8, C), dtype=jnp.float32) * 0.1
    bk = jax.random.normal(ks[4], (C8,), dtype=jnp.float32) * 0.1
    wv = jax.random.normal(ks[5], (C, C), dtype=jnp.float32) * 0.1
    bv = jax.random.normal(ks[6], (C,), dtype=jnp.float32) * 0.1
    # PyTorch inits gamma to 0 (out == x); use a nonzero value so the attention
    # paths are actually exercised.  Semantics hold for any gamma.
    gamma = jnp.float32(0.5)

    # tq=tkv=128 so the toy N=256 problem exercises multiple query tiles AND
    # the multi-step online-softmax accumulation path (PAM grid = (2, 2, 2)).
    pam_out = pam_forward(x, wq, bq, wk, bk, wv, bv, gamma, tq=128, tkv=128)
    cam_out = cam_forward(x, gamma, tn=128)
    pam_out, cam_out = jax.block_until_ready((pam_out, cam_out))

    pam_ref = pam_reference(x, wq, bq, wk, bk, wv, bv, gamma)
    cam_ref = cam_reference(x, gamma)
    assert pam_out.shape == (B, C, H, W) and cam_out.shape == (B, C, H, W)
    # bf16 MXU operands with f32 accumulation -> ~1e-2 tolerance vs f32 reference.
    assert jnp.allclose(pam_out, pam_ref, rtol=1e-2, atol=1e-2), "PAM mismatch"
    assert jnp.allclose(cam_out, cam_ref, rtol=1e-2, atol=1e-2), "CAM mismatch"

    print("KERNEL_OK")
</pallas_src>

<mosaic_0001>
module attributes {stable_mosaic.version = 11 : i64} {
  func.func @_pam_flash_kernel(%arg0: i32, %arg1: i32, %arg2: i32, %arg3: memref<1x32x128xf32, #tpu.memory_space<vmem>>, %arg4: memref<1x32x128xf32, #tpu.memory_space<vmem>>, %arg5: memref<4x32xf32, #tpu.memory_space<vmem>>, %arg6: memref<4x1xf32, #tpu.memory_space<vmem>>, %arg7: memref<4x32xf32, #tpu.memory_space<vmem>>, %arg8: memref<32x32xf32, #tpu.memory_space<vmem>>, %arg9: memref<32x1xf32, #tpu.memory_space<vmem>>, %arg10: memref<1xf32, #tpu.memory_space<smem>>, %arg11: memref<1x32x128xf32, #tpu.memory_space<vmem>>, %arg12: memref<4x128xbf16, #tpu.memory_space<vmem>>, %arg13: memref<1x128xf32, #tpu.memory_space<vmem>>, %arg14: memref<1x128xf32, #tpu.memory_space<vmem>>, %arg15: memref<32x128xf32, #tpu.memory_space<vmem>>) attributes {dimension_semantics = [#tpu.dimension_semantics<parallel>, #tpu.dimension_semantics<parallel>, #tpu.dimension_semantics<arbitrary>], iteration_bounds = array<i64: 2, 2, 2>, scalar_prefetch = 0 : i64, scratch_operands = 4 : i64, tpu.core_type = #tpu.core_type<tc>, window_params = [{transform_indices = @transform_0, window_bounds = array<i64: 1, 32, 128>}, {transform_indices = @transform_1, window_bounds = array<i64: 1, 32, 128>}, {pipeline_mode = #tpu.pipeline_mode<synchronous>, transform_indices = @transform_2, window_bounds = array<i64: 4, 32>}, {pipeline_mode = #tpu.pipeline_mode<synchronous>, transform_indices = @transform_3, window_bounds = array<i64: 4, 1>}, {pipeline_mode = #tpu.pipeline_mode<synchronous>, transform_indices = @transform_4, window_bounds = array<i64: 4, 32>}, {pipeline_mode = #tpu.pipeline_mode<synchronous>, transform_indices = @transform_5, window_bounds = array<i64: 32, 32>}, {pipeline_mode = #tpu.pipeline_mode<synchronous>, transform_indices = @transform_6, window_bounds = array<i64: 32, 1>}, {transform_indices = @transform_7, window_bounds = array<i64: 1>}, {transform_indices = @transform_8, window_bounds = array<i64: 1, 32, 128>}]} {
    %c0_i32 = arith.constant 0 : i32
    %0 = arith.cmpi eq, %arg2, %c0_i32 : i32
    %1 = arith.extui %0 : i1 to i32
    %c0_i32_0 = arith.constant 0 : i32
    %2 = arith.cmpi ne, %1, %c0_i32_0 : i32
    scf.if %2 {
      %c0_29 = arith.constant 0 : index
      %c0_30 = arith.constant 0 : index
      %c0_31 = arith.constant 0 : index
      %42 = vector.load %arg3[%c0_29, %c0_30, %c0_31] : memref<1x32x128xf32, #tpu.memory_space<vmem>>, vector<1x32x128xf32>
      %43 = vector.shape_cast %42 : vector<1x32x128xf32> to vector<32x128xf32>
      %c0_32 = arith.constant 0 : index
      %c0_33 = arith.constant 0 : index
      %44 = vector.load %arg5[%c0_32, %c0_33] : memref<4x32xf32, #tpu.memory_space<vmem>>, vector<4x32xf32>
      %cst_34 = arith.constant dense<0.000000e+00> : vector<4x128xf32>
      %45 = tpu.matmul %44, %43, %cst_34 {dimension_numbers = #tpu.dot_dimension_numbers<[1], [0], [0], [1], [0, 0, 1, 1], [], []>} : vector<4x32xf32>, vector<32x128xf32>, vector<4x128xf32> -> vector<4x128xf32>
      %c0_35 = arith.constant 0 : index
      %c0_36 = arith.constant 0 : index
      %46 = vector.load %arg6[%c0_35, %c0_36] : memref<4x1xf32, #tpu.memory_space<vmem>>, vector<4x1xf32>
      %47 = vector.broadcast %46 : vector<4x1xf32> to vector<4x128xf32>
      %48 = arith.addf %45, %47 : vector<4x128xf32>
      %49 = arith.truncf %48 : vector<4x128xf32> to vector<4x128xbf16>
      %c0_37 = arith.constant 0 : index
      %c0_38 = arith.constant 0 : index
      %50 = vector.load %arg12[%c0_37, %c0_38] : memref<4x128xbf16, #tpu.memory_space<vmem>>, vector<4x128xbf16>
      tpu.vector_store %arg12[%c0_37, %c0_38], %49 {strides = array<i32>} : memref<4x128xbf16, #tpu.memory_space<vmem>>, vector<4x128xbf16>,
      %cst_39 = arith.constant 0xFF800000 : f32
      %51 = vector.broadcast %cst_39 : f32 to vector<1x128xf32>
      %c0_40 = arith.constant 0 : index
      %c0_41 = arith.constant 0 : index
      %52 = vector.load %arg13[%c0_40, %c0_41] : memref<1x128xf32, #tpu.memory_space<vmem>>, vector<1x128xf32>
      tpu.vector_store %arg13[%c0_40, %c0_41], %51 {strides = array<i32>} : memref<1x128xf32, #tpu.memory_space<vmem>>, vector<1x128xf32>,
      %cst_42 = arith.constant 0.000000e+00 : f32
      %53 = vector.broadcast %cst_42 : f32 to vector<1x128xf32>
      %c0_43 = arith.constant 0 : index
      %c0_44 = arith.constant 0 : index
      %54 = vector.load %arg14[%c0_43, %c0_44] : memref<1x128xf32, #tpu.memory_space<vmem>>, vector<1x128xf32>
      tpu.vector_store %arg14[%c0_43, %c0_44], %53 {strides = array<i32>} : memref<1x128xf32, #tpu.memory_space<vmem>>, vector<1x128xf32>,
      %cst_45 = arith.constant 0.000000e+00 : f32
      %55 = vector.broadcast %cst_45 : f32 to vector<32x128xf32>
      %c0_46 = arith.constant 0 : index
      %c0_47 = arith.constant 0 : index
      %56 = vector.load %arg15[%c0_46, %c0_47] : memref<32x128xf32, #tpu.memory_space<vmem>>, vector<32x128xf32>
      tpu.vector_store %arg15[%c0_46, %c0_47], %55 {strides = array<i32>} : memref<32x128xf32, #tpu.memory_space<vmem>>, vector<32x128xf32>,
    } else {
    }
    %c0 = arith.constant 0 : index
    %c0_1 = arith.constant 0 : index
    %c0_2 = arith.constant 0 : index
    %3 = vector.load %arg4[%c0, %c0_1, %c0_2] : memref<1x32x128xf32, #tpu.memory_space<vmem>>, vector<1x32x128xf32>
    %4 = vector.shape_cast %3 : vector<1x32x128xf32> to vector<32x128xf32>
    %c0_3 = arith.constant 0 : index
    %c0_4 = arith.constant 0 : index
    %5 = vector.load %arg7[%c0_3, %c0_4] : memref<4x32xf32, #tpu.memory_space<vmem>>, vector<4x32xf32>
    %cst = arith.constant dense<0.000000e+00> : vector<4x128xf32>
    %6 = tpu.matmul %5, %4, %cst {dimension_numbers = #tpu.dot_dimension_numbers<[1], [0], [0], [1], [0, 0, 1, 1], [], []>} : vector<4x32xf32>, vector<32x128xf32>, vector<4x128xf32> -> vector<4x128xf32>
    %c0_5 = arith.constant 0 : index
    %c0_6 = arith.constant 0 : index
    %7 = vector.load %arg8[%c0_5, %c0_6] : memref<32x32xf32, #tpu.memory_space<vmem>>, vector<32x32xf32>
    %cst_7 = arith.constant dense<0.000000e+00> : vector<32x128xf32>
    %8 = tpu.matmul %7, %4, %cst_7 {dimension_numbers = #tpu.dot_dimension_numbers<[1], [0], [0], [1], [0, 0, 1, 1], [], []>} : vector<32x32xf32>, vector<32x128xf32>, vector<32x128xf32> -> vector<32x128xf32>
    %c0_8 = arith.constant 0 : index
    %c0_9 = arith.constant 0 : index
    %9 = vector.load %arg9[%c0_8, %c0_9] : memref<32x1xf32, #tpu.memory_space<vmem>>, vector<32x1xf32>
    %10 = vector.broadcast %9 : vector<32x1xf32> to vector<32x128xf32>
    %11 = arith.addf %8, %10 : vector<32x128xf32>
    %12 = arith.truncf %6 : vector<4x128xf32> to vector<4x128xbf16>
    %c0_10 = arith.constant 0 : index
    %c0_11 = arith.constant 0 : index
    %13 = vector.load %arg12[%c0_10, %c0_11] : memref<4x128xbf16, #tpu.memory_space<vmem>>, vector<4x128xbf16>
    %cst_12 = arith.constant dense<0.000000e+00> : vector<128x128xf32>
    %14 = tpu.matmul %12, %13, %cst_12 {dimension_numbers = #tpu.dot_dimension_numbers<[0], [0], [1], [1], [0, 1, 1, 1], [], []>} : vector<4x128xbf16>, vector<4x128xbf16>, vector<128x128xf32> -> vector<128x128xf32>
    %c0_13 = arith.constant 0 : index
    %c0_14 = arith.constant 0 : index
    %15 = vector.load %arg13[%c0_13, %c0_14] : memref<1x128xf32, #tpu.memory_space<vmem>>, vector<1x128xf32>
    %cst_15 = arith.constant dense<0xFF800000> : vector<128xf32>
    %16 = vector.multi_reduction <maximumf>, %14, %cst_15 [0] : vector<128x128xf32> to vector<128xf32>
    %17 = vector.shape_cast %16 : vector<128xf32> to vector<1x128xf32>
    %18 = arith.maximumf %15, %17 : vector<1x128xf32>
    %19 = arith.subf %15, %18 : vector<1x128xf32>
    %20 = math.exp %19 : vector<1x128xf32>
    %21 = vector.broadcast %18 : vector<1x128xf32> to vector<128x128xf32>
    %22 = arith.subf %14, %21 : vector<128x128xf32>
    %23 = math.exp %22 : vector<128x128xf32>
    %c0_16 = arith.constant 0 : index
    %c0_17 = arith.constant 0 : index
    %24 = vector.load %arg14[%c0_16, %c0_17] : memref<1x128xf32, #tpu.memory_space<vmem>>, vector<1x128xf32>
    %25 = arith.mulf %20, %24 : vector<1x128xf32>
    %cst_18 = arith.constant dense<0.000000e+00> : vector<128xf32>
    %26 = vector.multi_reduction <add>, %23, %cst_18 [0] : vector<128x128xf32> to vector<128xf32>
    %27 = vector.shape_cast %26 : vector<128xf32> to vector<1x128xf32>
    %28 = arith.addf %25, %27 : vector<1x128xf32>
    %c0_19 = arith.constant 0 : index
    %c0_20 = arith.constant 0 : index
    %29 = vector.load %arg14[%c0_19, %c0_20] : memref<1x128xf32, #tpu.memory_space<vmem>>, vector<1x128xf32>
    tpu.vector_store %arg14[%c0_19, %c0_20], %28 {strides = array<i32>} : memref<1x128xf32, #tpu.memory_space<vmem>>, vector<1x128xf32>,
    %c0_21 = arith.constant 0 : index
    %c0_22 = arith.constant 0 : index
    %30 = vector.load %arg15[%c0_21, %c0_22] : memref<32x128xf32, #tpu.memory_space<vmem>>, vector<32x128xf32>
    %31 = vector.broadcast %20 : vector<1x128xf32> to vector<32x128xf32>
    %32 = arith.mulf %31, %30 : vector<32x128xf32>
    %33 = arith.truncf %11 : vector<32x128xf32> to vector<32x128xbf16>
    %34 = arith.truncf %23 : vector<128x128xf32> to vector<128x128xbf16>
    %cst_23 = arith.constant dense<0.000000e+00> : vector<32x128xf32>
    %35 = tpu.matmul %33, %34, %cst_23 {dimension_numbers = #tpu.dot_dimension_numbers<[1], [0], [0], [1], [0, 0, 1, 1], [], []>} : vector<32x128xbf16>, vector<128x128xbf16>, vector<32x128xf32> -> vector<32x128xf32>
    %36 = arith.addf %32, %35 : vector<32x128xf32>
    %c0_24 = arith.constant 0 : index
    %c0_25 = arith.constant 0 : index
    %37 = vector.load %arg15[%c0_24, %c0_25] : memref<32x128xf32, #tpu.memory_space<vmem>>, vector<32x128xf32>
    tpu.vector_store %arg15[%c0_24, %c0_25], %36 {strides = array<i32>} : memref<32x128xf32, #tpu.memory_space<vmem>>, vector<32x128xf32>,
    %c0_26 = arith.constant 0 : index
    %c0_27 = arith.constant 0 : index
    %38 = vector.load %arg13[%c0_26, %c0_27] : memref<1x128xf32, #tpu.memory_space<vmem>>, vector<1x128xf32>
    tpu.vector_store %arg13[%c0_26, %c0_27], %18 {strides = array<i32>} : memref<1x128xf32, #tpu.memory_space<vmem>>, vector<1x128xf32>,
    %c1_i32 = arith.constant 1 : i32
    %39 = arith.cmpi eq, %arg2, %c1_i32 : i32
    %40 = arith.extui %39 : i1 to i32
    %c0_i32_28 = arith.constant 0 : i32
    %41 = arith.cmpi ne, %40, %c0_i32_28 : i32
    scf.if %41 {
      %c0_29 = arith.constant 0 : index
      %c0_30 = arith.constant 0 : index
      %42 = vector.load %arg14[%c0_29, %c0_30] : memref<1x128xf32, #tpu.memory_space<vmem>>, vector<1x128xf32>
      %43 = tpu.reciprocal %42 {approx = true} : vector<1x128xf32> -> vector<1x128xf32>
      %c0_31 = arith.constant 0 : index
      %44 = memref.load %arg10[%c0_31] : memref<1xf32, #tpu.memory_space<smem>>
      %c0_32 = arith.constant 0 : index
      %c0_33 = arith.constant 0 : index
      %45 = vector.load %arg15[%c0_32, %c0_33] : memref<32x128xf32, #tpu.memory_space<vmem>>, vector<32x128xf32>
      %46 = vector.broadcast %43 : vector<1x128xf32> to vector<32x128xf32>
      %47 = arith.mulf %45, %46 : vector<32x128xf32>
      %48 = vector.broadcast %44 : f32 to vector<32x128xf32>
      %49 = arith.mulf %48, %47 : vector<32x128xf32>
      %c0_34 = arith.constant 0 : index
      %c0_35 = arith.constant 0 : index
      %c0_36 = arith.constant 0 : index
      %50 = vector.load %arg3[%c0_34, %c0_35, %c0_36] : memref<1x32x128xf32, #tpu.memory_space<vmem>>, vector<1x32x128xf32>
      %51 = vector.shape_cast %50 : vector<1x32x128xf32> to vector<32x128xf32>
      %52 = arith.addf %49, %51 : vector<32x128xf32>
      %c0_37 = arith.constant 0 : index
      %c0_38 = arith.constant 0 : index
      %c0_39 = arith.constant 0 : index
      %53 = vector.load %arg11[%c0_37, %c0_38, %c0_39] : memref<1x32x128xf32, #tpu.memory_space<vmem>>, vector<1x32x128xf32>
      %54 = vector.shape_cast %53 : vector<1x32x128xf32> to vector<32x128xf32>
      %55 = vector.shape_cast %52 : vector<32x128xf32> to vector<1x32x128xf32>
      tpu.vector_store %arg11[%c0_37, %c0_38, %c0_39], %55 {strides = array<i32>} : memref<1x32x128xf32, #tpu.memory_space<vmem>>, vector<1x32x128xf32>,
    } else {
    }
    return
  }
  func.func @transform_0(%arg0: i32, %arg1: i32, %arg2: i32) -> (i32, i32, i32) {
    %c0_i32 = arith.constant 0 : i32
    %c0_i32_0 = arith.constant 0 : i32
    return %arg0, %c0_i32, %arg1 : i32, i32, i32
  }
  func.func @transform_1(%arg0: i32, %arg1: i32, %arg2: i32) -> (i32, i32, i32) {
    %c0_i32 = arith.constant 0 : i32
    %c0_i32_0 = arith.constant 0 : i32
    return %arg0, %c0_i32, %arg2 : i32, i32, i32
  }
  func.func @transform_2(%arg0: i32, %arg1: i32, %arg2: i32) -> (i32, i32) {
    %c0_i32 = arith.constant 0 : i32
    %c0_i32_0 = arith.constant 0 : i32
    %c0_i32_1 = arith.constant 0 : i32
    return %c0_i32, %c0_i32_0 : i32, i32
  }
  func.func @transform_3(%arg0: i32, %arg1: i32, %arg2: i32) -> (i32, i32) {
    %c0_i32 = arith.constant 0 : i32
    %c0_i32_0 = arith.constant 0 : i32
    %c0_i32_1 = arith.constant 0 : i32
    return %c0_i32, %c0_i32_0 : i32, i32
  }
  func.func @transform_4(%arg0: i32, %arg1: i32, %arg2: i32) -> (i32, i32) {
    %c0_i32 = arith.constant 0 : i32
    %c0_i32_0 = arith.constant 0 : i32
    %c0_i32_1 = arith.constant 0 : i32
    return %c0_i32, %c0_i32_0 : i32, i32
  }
  func.func @transform_5(%arg0: i32, %arg1: i32, %arg2: i32) -> (i32, i32) {
    %c0_i32 = arith.constant 0 : i32
    %c0_i32_0 = arith.constant 0 : i32
    %c0_i32_1 = arith.constant 0 : i32
    return %c0_i32, %c0_i32_0 : i32, i32
  }
  func.func @transform_6(%arg0: i32, %arg1: i32, %arg2: i32) -> (i32, i32) {
    %c0_i32 = arith.constant 0 : i32
    %c0_i32_0 = arith.constant 0 : i32
    %c0_i32_1 = arith.constant 0 : i32
    return %c0_i32, %c0_i32_0 : i32, i32
  }
  func.func @transform_7(%arg0: i32, %arg1: i32, %arg2: i32) -> i32 {
    %c0_i32 = arith.constant 0 : i32
    %c0_i32_0 = arith.constant 0 : i32
    return %c0_i32 : i32
  }
  func.func @transform_8(%arg0: i32, %arg1: i32, %arg2: i32) -> (i32, i32, i32) {
    %c0_i32 = arith.constant 0 : i32
    %c0_i32_0 = arith.constant 0 : i32
    return %arg0, %c0_i32, %arg1 : i32, i32, i32
  }
}

</mosaic_0001>

<bundles_post_ra>
// kernel: tpu_custom_call.1
= control target key start
LH: loop header
LB: loop body
LE: loop exit
PB: predicated region body
PF: predicated region fallthrough
CT: control target
= control target key end

     0   :  { %s1836_s0 = inlined_call_operand.hbm [shape: f32[2,32,256], index: 0, kind: input, shape index: {}]   ;;  %s1837_s1 = inlined_call_operand.hbm [shape: f32[2,32,256], index: 1, kind: input, shape index: {}]   ;;  %s1838_s2 = inlined_call_operand.vmem [shape: f32[4,32], index: 2, kind: input, shape index: {}]   ;;  %s1839_s3 = inlined_call_operand.vmem [shape: f32[4,1], index: 3, kind: input, shape index: {}]   ;;  %s1840_s4 = inlined_call_operand.vmem [shape: f32[4,32], index: 4, kind: input, shape index: {}]   ;;  %s1841_s5 = inlined_call_operand.vmem [shape: f32[32,32], index: 5, kind: input, shape index: {}]   ;;  %s1842_s6 = inlined_call_operand.vmem [shape: f32[32,1], index: 6, kind: input, shape index: {}]   ;;  %s1843_s7 = inlined_call_operand.<no memory space> [shape: f32[1], index: 7, kind: input, shape index: {}]   ;;  %s1844_s8 = inlined_call_operand.hbm [shape: f32[2,32,256], index: 8, kind: output, shape index: {}]  }
   0x1   :  { %1860 = sst [smem:[#allocation25_spill]] %s1836_s0 }
   0x2   :  { %1861 = sst [smem:[#allocation26_spill]] %s1838_s2 }
   0x3   :  { %1862 = sst [smem:[#allocation27_spill]] %s1839_s3 }
   0x4   :  { %1863 = sst [smem:[#allocation28_spill]] %s1840_s4 }
   0x5   :  { %1864 = sst [smem:[#allocation29_spill]] %s1841_s5 }
   0x6   :  { %1865 = sst [smem:[#allocation30_spill]] %s1842_s6 }
   0x7   :  { %1866 = sst [smem:[#allocation31_spill]] %s1844_s8 }
   0x8   :  { %13 = sst [smem:[#allocation6]] %s1843_s7 }
   0x9   :  { %14 = vsyncpa [#allocation8], 0 }
   0xa   :  { %16 = vsyncpa [#allocation8 + $0x1], 0 }
   0xb   :  { %17 = vsyncpa [#allocation11], 0 }
   0xc   :  { %19 = vsyncpa [#allocation11 + $0x1], 0 }
   0xd   :  { %20 = vsyncpa [#allocation9], 0 }
   0xe   :  { %22 = vsyncpa [#allocation9 + $0x1], 0  ;;  %s1432_s29 = smov 0   ;;  %s1434_s30 = smov 0  }
   0xf   :  { %s1436_s9 = smov 0   ;;  %s1438_s10 = smov 0  }
  0x10   :  { %s1440_s11 = smov 0   ;;  %s1442_s12 = smov 0  }
  0x11   :  { %s1444_s13 = smov 0   ;;  %s1446_s7 = smov 0  }
  0x12   :  { %s1448_s14 = smov 0   ;;  %s1450_s15 = smov 0  }
  0x13   :  { %s1452_s16 = smov 0   ;;  %s1454_s17 = smov 0  }
  0x14   :  { %s1456_s18 = smov 0  }
  0x15 LB: > { %1867 = sst [smem:[#allocation16_spill]] %s1336_s10  ;;  %s960_s19 = sadd.s32 4294967295, %s1372_s18   ;;  %s1372_s18 = sphi %s1456_s18, %s28_s18   ;;  %s1368_s17 = sphi %s1454_s17, %s1917_s17   ;;  %s1364_s16 = sphi %s1452_s16, %s1908_s16   ;;  %s1360_s15 = sphi %s1450_s15, %s1907_s15   ;;  %s1356_s14 = sphi %s1448_s14, %s1916_s14   ;;  %s1352_s7 = sphi %s1446_s7, %s1906_s7   ;;  %s1348_s13 = sphi %s1444_s13, %s1905_s13   ;;  %s1344_s12 = sphi %s1442_s12, %s1915_s12   ;;  %s1340_s11 = sphi %s1440_s11, %s1914_s11   ;;  %s1336_s10 = sphi %s1438_s10, %s1913_s10   ;;  %s1332_s9 = sphi %s1436_s9, %s1912_s9   ;;  %s1328_s30 = sphi %s1434_s30, %s1911_s30   ;;  %s1324_s29 = sphi %s1432_s29, %s1910_s29  }
  0x16   : > { %1868 = sst [smem:[#allocation17_spill]] %s1352_s7  ;;  %s961_s20 = sadd.s32 4294967294, %s1372_s18  }
  0x17   : > { %1869 = sst [smem:[#allocation18_spill]] %s1356_s14  ;;  %p63_p0 = scmp.ne.s32.totalorder %s1344_s12, %s1340_s11 }
  0x18   : > { %1870 = sst [smem:[#allocation19_spill]] %s1360_s15  ;;  %p64_p1 = scmp.eq.s32.totalorder %s1372_s18, 0 }
  0x19   : > { %1871 = sst [smem:[#allocation20_spill]] %s1364_s16  ;;  %p69_p2 = scmp.ne.s32.totalorder %s1340_s11, %s1336_s10 }
  0x1a   : > { %p1506_p3 = scmp.eq.s32.totalorder %s960_s19, 0  ;;  %p249_p4 = scmp.eq.s32.totalorder %s960_s19, 7 }
  0x1b   : > { %p1512_p5 = por %p64_p1, %p63_p0  ;;  %p255_p6 = scmp.eq.s32.totalorder %s961_s20, 7 }
  0x1c   : > { %p1518_p7 = por %p1506_p3, %p69_p2  ;;  %p1522_p8 = por %p249_p4, %p63_p0 }
  0x1d   : > { %p1526_p9 = por %p255_p6, %p69_p2  ;;  %p1014_p10 = scmp.lt.s32.totalorder %s1372_s18, 8 }
  0x1e   : > { %s1875_s26 = scalar_select %p1522_p8, 1, 0 }
  0x1f   : > { %s1877_s27 = scalar_select %p1526_p9, 1, 0 }
  0x20   : > { %1876 = sst [smem:[#allocation21_spill]] %s1875_s26  ;;  %s293_s28 = sand.u32 1, %s1344_s12  }
  0x21   : > { %1878 = sst [smem:[#allocation22_spill]] %s1877_s27  ;;  %s964_s19 = sshll.u32 %s293_s28, 5 }
  0x22   : > { %s1850_s22 = sshll.u32 %s1368_s17, 3  ;;  %s297_s21 = scalar_lea.vmem [#allocation7], %s964_s19 }
  0x23   : > { %s301_s20 = sadd.s32 %s1364_s16, %s1850_s22  ;;  %s306_s10 = sshll.u32 %s297_s21, 4  ;;  %s307_s10 = int_to_ptr.vmem [resolvable:$true] %s306_s10 }
  0x24   : > { %s966_s8 = sshll.u32 %s301_s20, 3  ;;  %s1879_s0 = sld [smem:[#allocation25_spill]] }
  0x25   : > { %p1004_p11 = pnand %p1014_p10, %p1512_p5  ;;  %s294_s19 = scalar_lea.sflag [#allocation8], %s293_s28 }
  0x26   : > { %s1851_s21 = smov 256   ;;  %s1852_s20 = smov 128  }
  0x27   : > { %s1853_s22 = smov 8   ;;  %p970_p12 = scmp.ge.s32.totalorder %s1372_s18, 1 }
  0x28   : > { %p337_p13 = scmp.lt.s32.totalorder %s1372_s18, 9  ;;  %p97_p4 = scmp.ne.s32.totalorder %s1328_s30, %s1324_s29 }
  0x29   : > { %p91_p5 = scmp.ne.s32.totalorder %s1332_s9, %s1328_s30  ;;  %s316_s28 = sand.u32 1, %s1332_s9  }
  0x2a   : > { %s303_s14 = scalar_lea.hbm %s1879_s0, %s966_s8  ;;  %p1549_p0 = pnand %p970_p12, %p337_p13 }
  0x2b   : > { %s304_s27 = sshll.u32 %s303_s14, 4  ;;  %s40_s14 = sadd.s32 1, %s1360_s15  ;;  %s305_s27 = int_to_ptr.hbm [resolvable:$true] %s304_s27 }
  0x2c   : > { %1006 = dma.hbm_to_vmem [thread:$0]  (!%p1004_p11), %s305_s27, 512, %s307_s10, %s294_s19, %s1851_s21, %s1852_s20, %s1853_s22  }
  0x2d   : > { %p41_p2 = scmp.ge.s32.totalorder %s40_s14, 2  ;;  %s1882_s10 = sadd.s32 1, %s1364_s16 }
  0x2e   : > { %p1568_p11 = por %p97_p4, %p1506_p3  ;;  %s1884_s19 = sshll.u32 %s1368_s17, 3 }
  0x2f   : > { %s1919_s14 = smov (%p41_p2, %s40_s14), 0  ;;  %s1921_s10 = smov (!%p41_p2, %s1882_s10), %s1364_s16 }
  0x30   : > { %1881 = sst [smem:[#allocation23_spill]] %s1919_s14  ;;  %s80_s26 = ssub.s32 %s1360_s15, %s1919_s14 }
  0x31   : > { %p45_p6 = scmp.ge.s32.totalorder %s1921_s10, 2  ;;  %s324_s21 = sadd.s32 %s1360_s15, %s1884_s19 }
  0x32   : > { %s1886_s29 = sadd.s32 1, %s1368_s17  ;;  %p1585_p12 = por %p91_p5, %p64_p1 }
  0x33   : > { %s1923_s10 = smov (%p45_p6, %s1921_s10), 0  ;;  %s1925_s29 = smov (!%p45_p6, %s1886_s29), %s1368_s17 }
  0x34   : > { %1885 = sst [smem:[#allocation24_spill]] %s1923_s10  ;;  %s52_s20 = ssub.s32 %s1364_s16, %s1923_s10 }
  0x35   : > { %p49_p3 = scmp.ge.s32.totalorder %s1925_s29, 2  ;;  %s967_s23 = sshll.u32 %s316_s28, 5 }
  0x36   : > { %s969_s19 = sshll.u32 %s324_s21, 3  ;;  %s320_s6 = scalar_lea.vmem [#allocation10], %s967_s23 }
  0x37   : > { %s1927_s29 = smov (%p49_p3, %s1925_s29), 0  ;;  %s326_s0 = scalar_lea.hbm %s1837_s1, %s969_s19 }
  0x38   : > { %s51_s10 = ssub.s32 %s1368_s17, %s1927_s29  ;;  %s327_s14 = sshll.u32 %s326_s0, 4  ;;  %s328_s14 = int_to_ptr.hbm [resolvable:$true] %s327_s14 }
  0x39   : > { %s53_s16 = sor.u32 %s52_s20, %s51_s10  ;;  %s81_s15 = sor.u32 %s80_s26, %s51_s10 }
  0x3a   : > { %p54_p1 = scmp.eq.s32.totalorder %s53_s16, 0  ;;  %p82_p13 = scmp.eq.s32.totalorder %s81_s15, 0 }
  0x3b   : > { %s329_s5 = sshll.u32 %s320_s6, 4  ;;  %s1888_s4 = sadd.s32 1, %s1344_s12  ;;  %s330_s5 = int_to_ptr.vmem [resolvable:$true] %s329_s5 }
  0x3c   : > { %s1599_s2 = scalar_select %p54_p1, %s1344_s12, %s1888_s4  }
  0x3d   : > { %s1889_s21 = sadd.s32 1, %s1332_s9  ;;  %p1007_p2 = pnand %p1014_p10, %p1585_p12 }
  0x3e   : > { %s1604_s3 = scalar_select %p82_p13, %s1332_s9, %s1889_s21  }
  0x3f   : > { %s317_s8 = scalar_lea.sflag [#allocation11], %s316_s28  ;;  %s1890_s24 = smov 8  }
  0x40   : > { %s1891_s0 = smov 128   ;;  %s1892_s20 = smov 256  }
  0x41   : > { %1009 = dma.hbm_to_vmem [thread:$0]  (!%p1007_p2), %s328_s14, 512, %s330_s5, %s317_s8, %s1892_s20, %s1891_s0, %s1890_s24  }
  0x42   : > { %341 = sbr.rel (%p1549_p0) target bundleno = 1063 (0x427), region = 52  ;;  %s1616_s6 = sand.u32 (!%p1549_p0), 1, %s1340_s11  }
  0x43   : > { %s971_s4 = sshll.u32 (!%p1549_p0), %s1616_s6, 5  ;;  %s344_s15 = scalar_lea.sflag (!%p1549_p0), [#allocation8], %s1616_s6 }
  0x44   : > { %s1620_s16 = scalar_lea.vmem (!%p1549_p0), [#allocation7], %s971_s4 }
  0x47   : > { %1311 = dma.done.wait (%p1518_p7), %s344_s15, 512  }
  0x48   : > { %1313 = vsyncadd (%p1518_p7), %s344_s15, 4294966784  ;;  %s353_s5 = sand.u32 1, %s1328_s30  }
  0x49   : > { %s972_s22 = sshll.u32 %s353_s5, 5  ;;  %s354_s7 = scalar_lea.sflag [#allocation11], %s353_s5 }
  0x4a   : > { %s1627_s14 = scalar_lea.vmem [#allocation10], %s972_s22 }
  0x4b   : > { %1315 = dma.done.wait (%p1568_p11), %s354_s7, 512  }
  0x4c   : > { %1317 = vsyncadd (%p1568_p11), %s354_s7, 4294966784  ;;  %s1633_s10 = scalar_lea.vmem [#allocation12], %s971_s4  ;;  %p974_p10 = scmp.ne.s32.totalorder %s1348_s13, 0 }
  0x4d   : > { %s1893_s28 = sld [smem:[#allocation27_spill]] (!%p974_p10) }
  0x4e   : > { %400 = sbr.rel (%p974_p10) target bundleno = 222 (0xde), region = 64  ;;  %s1894_s19 = sld [smem:[#allocation26_spill]] (!%p974_p10) }
  0x53   : > { %v404_v0 = vld [vmem:[%s1620_s16 + $0x18] sm:$0xff]  ;;  %v403_v1 = vld [vmem:[%s1620_s16 + $0x10] sm:$0xff]  ;;  %v1377_v2 = vmov 0   ;;  %v402_v4 = vld [vmem:[%s1620_s16 + $0x8] sm:$0xff]  ;;  %vm412_vm0 = vcmask 261120   ;;  %v1378_v7 = vmov -inf  }
  0x54   : > { %428 = vmatpush.msra.mxu0 %v404_v0  ;;  %1130 = vset.pattern.permute.xlu0 %v1377_v2  ;;  %v406_v3 = vld [vmem:[%s1893_s28] sm:$0xf]  ;;  %v401_v5 = vld [vmem:[%s1620_s16] sm:$0xff]  ;;  %438 = vst [vmem:[#allocation3] sm:$0x1] %v1378_v7  ;;  %v1379_v8 = vmov 0.0  }
  0x55   : > { %409 = vperm.xlu0 %1130, %v406_v3   ;;  %v405_v6 = vld [vmem:[%s1894_s19] sm:$0xf]  ;;  %439 = vst [vmem:[#allocation4] sm:$0x1] %v1379_v8 }
  0x56   : > { %429 = vmatpush.msra.mxu0 %v403_v1  ;;  %440 = vst [vmem:[#allocation5 + $0x10] sm:$0xff] %v1379_v8 }
  0x57   : > { %441 = vst [vmem:[#allocation5] sm:$0xff] %v1379_v8 }
  0x58   : > { %430 = vmatpush.msra.mxu0 %v402_v4  ;;  %442 = vst [vmem:[#allocation5 + $0x18] sm:$0xff] %v1379_v8 }
  0x59   : > { %443 = vst [vmem:[#allocation5 + $0x8] sm:$0xff] %v1379_v8 }
  0x5a   : > { %431 = vmatpush.msra.mxu0 %v401_v5 }
  0x5b   : > { %975 = vmatmul.msk.f32.vlgmr.msra.gmra.mxu0 %vm412_vm0, %v405_v6 }
  0xc7   : > { %v410_v9 = vpop.permute.xlu0 %409 }
  0xd8   : > { %v433_v10 = vpop.f32.mrf.mxu0 }
  0xd9   : > { %v434_v11 = vadd.f32 %v433_v10, %v410_v9 }
  0xdb   : > { %v436_v12 = vpack.c.bf16 %v434_v11, %v434_v11 }
  0xdd   : > { %437 = vst [vmem:[#allocation2] sm:$0x3] %v436_v12 }
  0xde PF: > { %v447_v13 = vld [vmem:[%s1627_s14 + $0x18] sm:$0xff]  ;;  %v446_v14 = vld [vmem:[%s1627_s14 + $0x10] sm:$0xff]  ;;  %v445_v15 = vld [vmem:[%s1627_s14 + $0x8] sm:$0xff]  ;;  %s1895_s24 = sld [smem:[#allocation28_spill]]  ;;  %vm449_vm1 = vcmask 261120   ;;  %vm585_vm2 = vcmask 1041408  }
  0xdf   : > { %465 = vmatpush.msra.mxu0 %v447_v13  ;;  %525 = vmatpush.msra.mxu1 %v447_v13  ;;  %v444_v16 = vld [vmem:[%s1627_s14] sm:$0xff]  ;;  %s1896_s4 = sld [smem:[#allocation29_spill]]  ;;  %vm560_vm3 = vcmask 31744   ;;  %v1380_v32 = vmov 0   ;;  %p989_p7 = scmp.ne.s32.totalorder %s1348_s13, 1 }
  0xe0   : > { %s1897_s27 = sld [smem:[#allocation30_spill]]  ;;  %1132 = vset.pattern.permute.xlu1 %v1380_v32  ;;  %1133 = vset.pattern.permute.xlu2 %v1380_v32 }
  0xe1   : > { %466 = vmatpush.msra.mxu0 %v446_v14  ;;  %526 = vmatpush.msra.mxu1 %v446_v14  ;;  %s795_s20 = sld [smem:[#allocation6]] (!%p989_p7) }
  0xe3   : > { %467 = vmatpush.msra.mxu0 %v445_v15  ;;  %527 = vmatpush.msra.mxu1 %v445_v15 }
  0xe4   : > { %v448_v17 = vld [vmem:[%s1895_s24] sm:$0xf] }
  0xe5   : > { %468 = vmatpush.msra.mxu0 %v444_v16  ;;  %528 = vmatpush.msra.mxu1 %v444_v16  ;;  %v543_v18 = vld [vmem:[#allocation2] sm:$0x3]  ;;  %v474_v23 = vld [vmem:[%s1896_s4 + $0x8] sm:$0xff]  ;;  %v475_v25 = vld [vmem:[%s1896_s4 + $0x10] sm:$0xff] }
  0xe6   : > { %976 = vmatmul.msk.f32.vlgmr.msra.gmra.mxu0 %vm449_vm1, %v448_v17  ;;  %v587_v19 = vsel %vm585_vm2, %v543_v18, 0  ;;  %v473_v22 = vld [vmem:[%s1896_s4] sm:$0xff]  ;;  %v476_v26 = vld [vmem:[%s1896_s4 + $0x18] sm:$0xff]  ;;  %v478_v30 = vld [vmem:[%s1897_s27 + $0x8] sm:$0xff] }
  0xe7   : > { %596 = vmatpush.bf16.msrb.mxu0 %v587_v19  ;;  %995 = vmatpush.bf16.msrb.mxu1 %v587_v19  ;;  %v477_v31 = vld [vmem:[%s1897_s27] sm:$0xff]  ;;  %v479_v34 = vld [vmem:[%s1897_s27 + $0x10] sm:$0xff]  ;;  %v480_v36 = vld [vmem:[%s1897_s27 + $0x18] sm:$0xff] }
  0xe8   : > { %996 = vmatpush.bf16.msra.mxu2 %v587_v19  ;;  %977 = vmatmul.msk.f32.vlgmr.msra.gmra.mxu1 %vm449_vm1, %v473_v22 }
  0xe9   : > { %488 = vperm.xlu1 %1132, %v478_v30   ;;  %498 = vperm.xlu2 %1133, %v480_v36  }
  0xf0   : > { %978 = vmatmul.msk.f32.gmra.mxu1 %vm449_vm1, %v474_v23 }
  0xf1   : > { %493 = vperm.xlu1 %1132, %v479_v34  }
  0xf8   : > { %979 = vmatmul.msk.f32.gmra.mxu1 %vm449_vm1, %v475_v25  ;;  %v1723_v25 = vld [vmem:[#allocation3] sm:$0x1] }
 0x100   : > { %980 = vmatmul.msk.f32.gmra.mxu1 %vm449_vm1, %v476_v26 }
 0x143   : > { %v499_v51 = vpop.permute.xlu2 %498 }
 0x15b   : > { %v489_v41 = vpop.permute.xlu1 %488 }
 0x163   : > { %v470_v20 = vpop.f32.mrf.mxu0  ;;  %v494_v52 = vpop.permute.xlu1 %493 }
 0x164   : > { %v542_v21 = vpack.c.bf16 %v470_v20, %v470_v20 }
 0x165   : > { %v530_v39 = vpop.f32.mrf.mxu1 }
 0x166   : > { %544 = vxpose.xlu0.c.b16.start.end [1/1] (short) %v542_v21, 128 }
 0x16d   : > { %v533_v40 = vpop.f32.mrf.mxu1 }
 0x16e   : > { %v1690_v43 = vadd.f32 %v533_v40, %v489_v41 }
 0x175   : > { %v536_v48 = vpop.f32.mrf.mxu1 }
 0x176   : > { %v1702_v55 = vadd.f32 %v536_v48, %v494_v52 }
 0x17d   : > { %v539_v53 = vpop.f32.mrf.mxu1 }
 0x17e   : > { %v1700_v54 = vadd.f32 %v539_v53, %v499_v51 }
 0x180   : > { %v752_v57 = vpack.c.bf16 %v1700_v54, %v1702_v55 }
 0x1cd   : > { %1131 = vset.pattern.permute.xlu0 %v1380_v32 }
 0x212   : > { %v552_v24 = vpop.trf.xlu0 }
 0x213   : > { %981 = vmatmul.msk.bf16.vlgmr.msrb.gmra.mxu0 %vm560_vm3, %v552_v24 }
 0x222   : > { %v553_v27 = vpop.trf.xlu0 }
 0x223   : > { %982 = vmatmul.msk.bf16.gmra.mxu0 %vm560_vm3, %v553_v27 }
 0x232   : > { %v554_v28 = vpop.trf.xlu0 }
 0x233   : > { %983 = vmatmul.msk.bf16.gmra.mxu0 %vm560_vm3, %v554_v28 }
 0x242   : > { %v555_v29 = vpop.trf.xlu0 }
 0x243   : > { %984 = vmatmul.msk.bf16.vlgmr.msrb.gmra.mxu1 %vm560_vm3, %v555_v29 }
 0x244   : > { %483 = vperm.xlu0 %1131, %v477_v31  }
 0x252   : > { %v556_v33 = vpop.trf.xlu0 }
 0x253   : > { %985 = vmatmul.msk.bf16.vlgmr.msra.gmra.mxu2 %vm560_vm3, %v556_v33 }
 0x262   : > { %v557_v35 = vpop.trf.xlu0 }
 0x263   : > { %986 = vmatmul.msk.bf16.gmra.mxu2 %vm560_vm3, %v557_v35 }
 0x272   : > { %v558_v37 = vpop.trf.xlu0 }
 0x273   : > { %987 = vmatmul.msk.bf16.gmra.mxu2 %vm560_vm3, %v558_v37 }
 0x282   : > { %v559_v38 = vpop.trf.xlu0 }
 0x283   : > { %988 = vmatmul.msk.bf16.gmra.mxu2 %vm560_vm3, %v559_v38 }
 0x290   : > { %v598_v45 = vpop.f32.mrf.mxu0 }
 0x298   : > { %v600_v49 = vpop.f32.mrf.mxu0 }
 0x2a0   : > { %v603_v58 = vpop.f32.mrf.mxu0 }
 0x2a8   : > { %v605_v60 = vpop.f32.mrf.mxu0 }
 0x2b0   : > { %v608_v62 = vpop.f32.mrf.mxu0 }
 0x2b1   : > { %v639_v5 = vmax.f32 %v598_v45, %v608_v62 }
 0x2b6   : > { %v484_v42 = vpop.permute.xlu0 %483 }
 0x2b7   : > { %v1692_v44 = vadd.f32 %v530_v39, %v484_v42 }
 0x2b8   : > { %v610_v1 = vpop.f32.mrf.mxu0 }
 0x2b9   : > { %v751_v47 = vpack.c.bf16 %v1690_v43, %v1692_v44  ;;  %v640_v4 = vmax.f32 %v600_v49, %v610_v1  ;;  %v743_v44 = vld [vmem:[#allocation5 + $0x8] sm:$0xff] }
 0x2c0   : > { %v613_v63 = vpop.f32.mrf.mxu1 }
 0x2c1   : > { %v641_v6 = vmax.f32 %v603_v58, %v613_v63 }
 0x2c8   : > { %v615_v3 = vpop.f32.mrf.mxu1 }
 0x2c9   : > { %v642_v7 = vmax.f32 %v605_v60, %v615_v3 }
 0x2d6   : > { %v1694_v46 = vpop.f32.mrf.mxu2 }
 0x2d7   : > { %v643_v9 = vmax.f32 %v639_v5, %v1694_v46 }
 0x2de   : > { %v1698_v50 = vpop.f32.mrf.mxu2 }
 0x2df   : > { %v644_v8 = vmax.f32 %v640_v4, %v1698_v50 }
 0x2e6   : > { %v1704_v56 = vpop.f32.mrf.mxu2 }
 0x2e7   : > { %v645_v10 = vmax.f32 %v641_v6, %v1704_v56 }
 0x2ee   : > { %v1708_v59 = vpop.f32.mrf.mxu2 }
 0x2ef   : > { %v646_v11 = vmax.f32 %v642_v7, %v1708_v59 }
 0x2f6   : > { %v1710_v61 = vpop.f32.mrf.mxu2 }
 0x2f7   : > { %v647_v14 = vmax.f32 %v643_v9, %v1710_v61 }
 0x2fe   : > { %v1712_v0 = vpop.f32.mrf.mxu2 }
 0x2ff   : > { %v648_v12 = vmax.f32 %v644_v8, %v1712_v0 }
 0x301   : > { %v651_v17 = vmax.f32 %v647_v14, %v648_v12 }
 0x306   : > { %v1714_v2 = vpop.f32.mrf.mxu2 }
 0x307   : > { %v649_v15 = vmax.f32 %v645_v10, %v1714_v2 }
 0x30e   : > { %v635_v13 = vpop.f32.mrf.mxu2 }
 0x30f   : > { %v650_v16 = vmax.f32 %v646_v11, %v635_v13 }
 0x311   : > { %v652_v18 = vmax.f32 %v649_v15, %v650_v16 }
 0x313   : > { %v653_v19 = vmax.f32 %v651_v17, %v652_v18 }
 0x315   : > { %v654_v20 = vrot.slane %v653_v19, 4 }
 0x317   : > { %v655_v21 = vmax.f32 %v653_v19, %v654_v20 }
 0x319   : > { %v656_v22 = vrot.slane %v655_v21, 2 }
 0x31b   : > { %v657_v23 = vmax.f32 %v655_v21, %v656_v22 }
 0x31d   : > { %v658_v24 = vrot.slane %v657_v23, 1 }
 0x31f   : > { %v659_v26 = vmax.f32 %v657_v23, %v658_v24 }
 0x321   : > { %v1726_v27 = vmax.f32 %v1723_v25, %v659_v26 }
 0x323   : > { %v665_v28 = vperm.slane %v1726_v27, 0  ;;  %788 = vst [vmem:[#allocation3] sm:$0x1] %v1726_v27 }
 0x325   : > { %v667_v29 = vsub.f32 %v598_v45, %v665_v28  ;;  %v668_v30 = vsub.f32 %v600_v49, %v665_v28  ;;  %v669_v31 = vsub.f32 %v603_v58, %v665_v28  ;;  %v670_v32 = vsub.f32 %v605_v60, %v665_v28 }
 0x326   : > { %v671_v35 = vsub.f32 %v608_v62, %v665_v28  ;;  %v672_v37 = vsub.f32 %v610_v1, %v665_v28  ;;  %v682_v39 = vsub.f32 %v635_v13, %v665_v28  ;;  %v673_v40 = vsub.f32 %v613_v63, %v665_v28 }
 0x327   : > { %v683_v33 = vmul.f32 1.442695, %v667_v29  ;;  %v685_v34 = vmul.f32 1.442695, %v668_v30  ;;  %v687_v36 = vmul.f32 1.442695, %v669_v31  ;;  %v674_v42 = vsub.f32 %v615_v3, %v665_v28 }
 0x328   : > { %v689_v38 = vmul.f32 1.442695, %v670_v32  ;;  %v691_v41 = vmul.f32 1.442695, %v671_v35  ;;  %v675_v48 = vsub.f32 %v1694_v46, %v665_v28  ;;  %v693_v45 = vmul.f32 1.442695, %v672_v37 }
 0x329   : > { %1134 = vpow2.f32 %v683_v33  ;;  %v713_v51 = vmul.f32 1.442695, %v682_v39  ;;  %v681_v52 = vsub.f32 %v1714_v2, %v665_v28  ;;  %v679_v58 = vsub.f32 %v1710_v61, %v665_v28 }
 0x32a   : > { %1136 = vpow2.f32 %v685_v34  ;;  %v695_v60 = vmul.f32 1.442695, %v673_v40  ;;  %v680_v62 = vsub.f32 %v1712_v0, %v665_v28  ;;  %v697_v63 = vmul.f32 1.442695, %v674_v42 }
 0x32b   : > { %1138 = vpow2.f32 %v687_v36  ;;  %v676_v3 = vsub.f32 %v1698_v50, %v665_v28  ;;  %v699_v4 = vmul.f32 1.442695, %v675_v48  ;;  %v711_v2 = vmul.f32 1.442695, %v681_v52 }
 0x32c   : > { %1140 = vpow2.f32 %v689_v38  ;;  %v677_v61 = vsub.f32 %v1704_v56, %v665_v28  ;;  %v707_v0 = vmul.f32 1.442695, %v679_v58  ;;  %v678_v7 = vsub.f32 %v1708_v59, %v665_v28 }
 0x32d   : > { %1142 = vpow2.f32 %v691_v41  ;;  %v709_v8 = vmul.f32 1.442695, %v680_v62  ;;  %v701_v50 = vmul.f32 1.442695, %v676_v3  ;;  %v661_v36 = vsub.f32 %v1723_v25, %v1726_v27  ;;  %v715_v62 = vld [vmem:[#allocation4] sm:$0x1] }
 0x32e   : > { %1144 = vpow2.f32 %v693_v45  ;;  %v703_v13 = vmul.f32 1.442695, %v677_v61  ;;  %v705_v15 = vmul.f32 1.442695, %v678_v7 }
 0x32f   : > { %v1731_v49 = vpop.eup %1134  ;;  %1146 = vpow2.f32 %v713_v51  ;;  %v662_v40 = vmul.f32 1.442695, %v661_v36 }
 0x330   : > { %v1734_v53 = vpop.eup %1136  ;;  %1148 = vpow2.f32 %v695_v60 }
 0x331   : > { %v717_v1 = vadd.f32 %v1734_v53, %v1731_v49  ;;  %v1740_v46 = vpop.eup %1138  ;;  %1150 = vpow2.f32 %v697_v63  ;;  %v753_v3 = vpack.c.bf16 %v1734_v53, %v1731_v49 }
 0x332   : > { %v1744_v6 = vpop.eup %1140  ;;  %1152 = vpow2.f32 %v699_v4 }
 0x333   : > { %v718_v5 = vadd.f32 %v1740_v46, %v717_v1  ;;  %v1143_v10 = vpop.eup %1142  ;;  %1154 = vpow2.f32 %v711_v2  ;;  %v754_v25 = vpack.c.bf16 %v1744_v6, %v1740_v46  ;;  %v740_v46 = vld [vmem:[#allocation5 + $0x10] sm:$0xff] }
 0x334   : > { %v1145_v12 = vpop.eup %1144  ;;  %1156 = vpow2.f32 %v707_v0  ;;  %v741_v0 = vld [vmem:[#allocation5] sm:$0xff] }
 0x335   : > { %v719_v9 = vadd.f32 %v1744_v6, %v718_v5  ;;  %v1147_v14 = vpop.eup %1146  ;;  %1158 = vpow2.f32 %v709_v8  ;;  %v755_v51 = vpack.c.bf16 %v1145_v12, %v1143_v10  ;;  %v742_v8 = vld [vmem:[#allocation5 + $0x18] sm:$0xff] }
 0x336   : > { %v1149_v16 = vpop.eup %1148  ;;  %1160 = vpow2.f32 %v701_v50 }
 0x337   : > { %v720_v11 = vadd.f32 %v1143_v10, %v719_v9  ;;  %v1151_v17 = vpop.eup %1150  ;;  %1162 = vpow2.f32 %v703_v13 }
 0x338   : > { %v1153_v18 = vpop.eup %1152  ;;  %1164 = vpow2.f32 %v705_v15  ;;  %v756_v42 = vpack.c.bf16 %v1151_v17, %v1149_v16 }
 0x339   : > { %v721_v56 = vadd.f32 %v1145_v12, %v720_v11  ;;  %v1155_v19 = vpop.eup %1154  ;;  %1166 = vpow2.f32 %v662_v40 }
 0x33a   : > { %v1157_v21 = vpop.eup %1156  ;;  %v760_v22 = vpack.c.bf16 %v1147_v14, %v1155_v19 }
 0x33b   : > { %v722_v59 = vadd.f32 %v1149_v16, %v721_v56  ;;  %v1159_v23 = vpop.eup %1158 }
 0x33c   : > { %v1161_v26 = vpop.eup %1160  ;;  %761 = vmatpush.bf16.msra.mxu3 %v760_v22  ;;  %v759_v30 = vpack.c.bf16 %v1159_v23, %v1157_v21 }
 0x33d   : > { %v723_v20 = vadd.f32 %v1151_v17, %v722_v59  ;;  %v1163_v29 = vpop.eup %1162  ;;  %v757_v38 = vpack.c.bf16 %v1161_v26, %v1153_v18 }
 0x33e   : > { %v1165_v31 = vpop.eup %1164 }
 0x33f   : > { %v724_v24 = vadd.f32 %v1153_v18, %v723_v20  ;;  %v758_v34 = vpack.c.bf16 %v1165_v31, %v1163_v29  ;;  %v1167_v60 = vpop.eup %1166 }
 0x340   : > { %762 = vmatpush.bf16.msra.mxu3 %v759_v30  ;;  %v716_v63 = vmul.f32 %v1167_v60, %v715_v62  ;;  %v745_v2 = vperm.slane %v1167_v60, 0 }
 0x341   : > { %v725_v28 = vadd.f32 %v1161_v26, %v724_v24 }
 0x342   : > { %v747_v5 = vmul.f32 %v745_v2, %v740_v46  ;;  %v748_v7 = vmul.f32 %v745_v2, %v741_v0  ;;  %v749_v9 = vmul.f32 %v745_v2, %v742_v8 }
 0x343   : > { %v726_v32 = vadd.f32 %v1163_v29, %v725_v28 }
 0x344   : > { %763 = vmatpush.bf16.msra.mxu3 %v758_v34 }
 0x345   : > { %v727_v33 = vadd.f32 %v1165_v31, %v726_v32 }
 0x347   : > { %v728_v35 = vadd.f32 %v1157_v21, %v727_v33 }
 0x348   : > { %764 = vmatpush.bf16.msra.mxu3 %v757_v38 }
 0x349   : > { %v729_v37 = vadd.f32 %v1159_v23, %v728_v35 }
 0x34b   : > { %v730_v39 = vadd.f32 %v1155_v19, %v729_v37 }
 0x34c   : > { %765 = vmatpush.bf16.msra.mxu3 %v756_v42 }
 0x34d   : > { %v731_v41 = vadd.f32 %v1147_v14, %v730_v39 }
 0x34f   : > { %v732_v48 = vrot.slane %v731_v41, 4 }
 0x350   : > { %766 = vmatpush.bf16.msra.mxu3 %v755_v51 }
 0x351   : > { %v733_v45 = vadd.f32 %v732_v48, %v731_v41 }
 0x353   : > { %v734_v52 = vrot.slane %v733_v45, 2 }
 0x354   : > { %767 = vmatpush.bf16.msra.mxu3 %v754_v25 }
 0x355   : > { %v735_v58 = vadd.f32 %v734_v52, %v733_v45 }
 0x357   : > { %v736_v27 = vrot.slane %v735_v58, 1 }
 0x358   : > { %768 = vmatpush.bf16.msra.mxu3 %v753_v3 }
 0x359   : > { %v737_v1 = vadd.f32 %v736_v27, %v735_v58 }
 0x35b   : > { %v738_v4 = vadd.f32 %v737_v1, %v716_v63  ;;  %769 = vmatmul.bf16.vlgmr.msra.gmra.mxu3 %v751_v47  ;;  %v750_v47 = vmul.f32 %v745_v2, %v743_v44 }
 0x35d   : > { %739 = vst [vmem:[#allocation4] sm:$0x1] %v738_v4 }
 0x36b   : > { %774 = vmatmul.bf16.gmra.mxu3 %v752_v57 }
 0x3de   : > { %v770_v6 = vpop.f32.mrf.mxu3 }
 0x3df   : > { %v780_v61 = vadd.f32 %v770_v6, %v747_v5 }
 0x3e1   : > { %784 = vst [vmem:[#allocation5 + $0x10] sm:$0xff] %v780_v61 }
 0x3e6   : > { %v772_v49 = vpop.f32.mrf.mxu3 }
 0x3e7   : > { %v781_v53 = vadd.f32 %v772_v49, %v748_v7 }
 0x3e9   : > { %785 = vst [vmem:[#allocation5] sm:$0xff] %v781_v53 }
 0x3ee   : > { %v775_v10 = vpop.f32.mrf.mxu3 }
 0x3ef   : > { %v782_v43 = vadd.f32 %v775_v10, %v749_v9 }
 0x3f1   : > { %786 = vst [vmem:[#allocation5 + $0x18] sm:$0xff] %v782_v43 }
 0x3f5   : > { %792 = sbr.rel (%p989_p7) target bundleno = 1038 (0x40e), region = 68 }
 0x3f6   : > { %v777_v54 = vpop.f32.mrf.mxu3 }
 0x3f7   : > { %v783_v55 = vadd.f32 %v777_v54, %v750_v47 }
 0x3f9   : > { %787 = vst [vmem:[#allocation5 + $0x8] sm:$0xff] %v783_v55 }
 0x3fa   : > { %v793_v57 = vld [vmem:[#allocation4] sm:$0x1]  ;;  %v796_v50 = vld [vmem:[#allocation5 + $0x10] sm:$0xff]  ;;  %v797_v12 = vld [vmem:[#allocation5] sm:$0xff]  ;;  %v807_v56 = vstv %s795_s20 }
 0x3fb   : > { %1168 = vrcp.f32 %v793_v57  ;;  %v798_v13 = vld [vmem:[#allocation5 + $0x18] sm:$0xff]  ;;  %v812_v19 = vld [vmem:[%s1620_s16] sm:$0xff]  ;;  %v813_v20 = vld [vmem:[%s1620_s16 + $0x8] sm:$0xff] }
 0x3fc   : > { %v814_v21 = vld [vmem:[%s1620_s16 + $0x10] sm:$0xff]  ;;  %v815_v28 = vld [vmem:[%s1620_s16 + $0x18] sm:$0xff] }
 0x400   : > { %v799_v14 = vld [vmem:[#allocation5 + $0x8] sm:$0xff] }
 0x401   : > { %v1169_v11 = vpop.eup %1168 }
 0x402   : > { %v801_v15 = vperm.slane %v1169_v11, 0 }
 0x404   : > { %v803_v16 = vmul.f32 %v801_v15, %v796_v50  ;;  %v804_v17 = vmul.f32 %v801_v15, %v797_v12  ;;  %v805_v59 = vmul.f32 %v801_v15, %v798_v13  ;;  %v806_v18 = vmul.f32 %v801_v15, %v799_v14 }
 0x406   : > { %v808_v22 = vmul.f32 %v807_v56, %v803_v16  ;;  %v809_v23 = vmul.f32 %v807_v56, %v804_v17  ;;  %v810_v24 = vmul.f32 %v807_v56, %v805_v59  ;;  %v811_v26 = vmul.f32 %v807_v56, %v806_v18 }
 0x408   : > { %v816_v29 = vadd.f32 %v812_v19, %v808_v22  ;;  %v817_v30 = vadd.f32 %v813_v20, %v809_v23  ;;  %v818_v31 = vadd.f32 %v814_v21, %v810_v24  ;;  %v819_v32 = vadd.f32 %v815_v28, %v811_v26 }
 0x40a   : > { %820 = vst [vmem:[%s1633_s10] sm:$0xff] %v816_v29 }
 0x40b   : > { %821 = vst [vmem:[%s1633_s10 + $0x8] sm:$0xff] %v817_v30 }
 0x40c   : > { %822 = vst [vmem:[%s1633_s10 + $0x10] sm:$0xff] %v818_v31 }
 0x40d   : > { %823 = vst [vmem:[%s1633_s10 + $0x18] sm:$0xff] %v819_v32 }
 0x40e PF: > { %s1898_s13 = sld [smem:[#allocation18_spill]]  ;;  %s838_s14 = sshll.u32 %s1633_s10, 4  ;;  %s839_s14 = int_to_ptr.vmem [resolvable:$true] %s838_s14 }
 0x40f   : > { %s1899_s15 = sld [smem:[#allocation17_spill]]  ;;  %s825_s21 = scalar_lea.sflag [#allocation9], %s1616_s6 }
 0x410   : > { %s1901_s28 = sld [smem:[#allocation31_spill]] }
 0x414   : > { %s991_s22 = sshll.u32 %s1898_s13, 3 }
 0x415   : > { %s835_s7 = sadd.s32 %s1899_s15, %s991_s22 }
 0x416   : > { %s992_s25 = sshll.u32 %s835_s7, 3  ;;  %s1250_s10 = scalar_lea.hbm %s1901_s28, 128 }
 0x417   : > { %s837_s23 = scalar_lea.hbm %s1901_s28, %s992_s25 }
 0x418   : > { %s840_s19 = sshll.u32 %s837_s23, 4  ;;  %s841_s19 = int_to_ptr.hbm [resolvable:$true] %s840_s19 }
 0x419   : > { %s1244_s8 = sshra.s32 %s841_s19, 4  ;;  %s1245_s8 = int_to_ptr.hbm [resolvable:$true] %s1244_s8 }
 0x41a   : > { %s1246_s24 = scalar_lea.hbm %s1245_s8, 32  ;;  %p1251_p6 = scmp.lt.s32.totalorder %s1245_s8, %s1901_s28 }
 0x41b   : > { %p1247_p0 = scmp.ne.s32.totalorder %s1245_s8, %s1246_s24  ;;  %p1252_p11 = scmp.lt.s32.totalorder %s1250_s10, %s1246_s24 }
 0x41d   : > { %p1248_p4 = pnand %p1247_p0, %p1522_p8  ;;  %p1253_p12 = por %p1252_p11, %p1251_p6 }
 0x41f   : > { %p1249_p5 = pneg %p1248_p4 }
 0x421   : > { %p1254_p3 = pnand %p1253_p12, %p1249_p5 }
 0x423   : > { %1257 = shalt.err (!%p1254_p3)
}
 0x424   : > { %s1381_s6 = smov 128   ;;  %s1382_s22 = smov 256  }
 0x425   : > { %s1383_s7 = smov 8  }
 0x426   : > { %1001 = dma.vmem_to_hbm [thread:$0]  (%p1522_p8), %s839_s14, 512, %s841_s19, %s825_s21, %s1381_s6, %s1382_s22, %s1383_s7  }
 0x427 PF: > { %s1902_s25 = sld [smem:[#allocation16_spill]]  ;;  %p1015_p1 = scmp.ge.s32.totalorder %s1372_s18, 2 }
 0x429   : > { %p1011_p13 = pnand %p1015_p1, %p1526_p9 }
 0x42b   : > { %p1012_p2 = pneg %p1011_p13 }
 0x42d   : > { %s855_s26 = sand.u32 1, %s1902_s25  }
 0x42e   : > { %s856_s23 = scalar_lea.sflag [#allocation9], %s855_s26 }
 0x42f   : > { %1319 = dma.done.wait (%p1012_p2), %s856_s23, 512  }
 0x430   : > { %1321 = vsyncadd (%p1012_p2), %s856_s23, 4294966784  ;;  %s28_s18 = sadd.s32 1, %s1372_s18   ;;  %s1905_s13 = sld [smem:[#allocation19_spill]] }
 0x431   : > { %p1792_p10 = scmp.ge.s32.totalorder %s28_s18, 10   ;;  %s1906_s7 = sld [smem:[#allocation20_spill]] }
 0x432   : > { %s1907_s15 = sld [smem:[#allocation23_spill]]  ;;  %s1909_s5 = smov %s1927_s29 }
 0x433   : > { %s1908_s16 = sld [smem:[#allocation24_spill]]  ;;  %s1910_s29 = smov %s1328_s30 }
 0x434   : > { %s1911_s30 = smov %s1332_s9  ;;  %s1912_s9 = smov %s1604_s3 }
 0x435   : > { %s1913_s10 = smov %s1340_s11  ;;  %s1914_s11 = smov %s1344_s12 }
 0x436   : > { %s1915_s12 = smov %s1599_s2  ;;  %s1916_s14 = smov %s1368_s17 }
 0x437   : > { %s1917_s17 = smov %s1909_s5  ;;  %27 = sbr.rel (!%p1792_p10) target bundleno = 21 (0x15), region = 118 }
 0x43c   :  { %862 = vsyncpa [#allocation8], 1 }
 0x43d   :  { %864 = vsyncpa [#allocation8 + $0x1], 1 }
 0x43e   :  { %865 = vsyncpa [#allocation11], 1 }
 0x43f   :  { %867 = vsyncpa [#allocation11 + $0x1], 1 }
 0x440   :  { %868 = vsyncpa [#allocation9], 1 }
 0x441   :  { %870 = vsyncpa [#allocation9 + $0x1], 1 }

</bundles_post_ra>
